<compile_context>
chip_gen: v7x
topology: tpu7x:2x2x1
jax: 0.10.0
libtpu: 0.0.40
codegen_flags: <defaults>
</compile_context>

<pallas_src>
import jax
import jax.numpy as jnp
from jax.experimental import pallas as pl
from jax.experimental.pallas import tpu as pltpu


def _round_up(x, m):
    return (x + m - 1) // m * m


def mlp_softmax_kernel(x_ref, w1_ref, b1_ref, w2_ref, b2_ref, o_ref):
    # fc1: (TB, In) @ (In, Hp) + (1, Hp)   -- Hp padded to 128, lane-dense
    x = x_ref[...]
    h = jnp.dot(x, w1_ref[...], preferred_element_type=jnp.float32) + b1_ref[...]
    # ReLU
    h = jnp.maximum(h, 0.0)
    # fc3: (TB, Hp) @ (Hp, Out) + (1, Out); zero-padded rows of w2 contribute 0
    logits = jnp.dot(h, w2_ref[...], preferred_element_type=jnp.float32) + b2_ref[...]
    # softmax over last dim (PyTorch F.softmax on a 2-D tensor defaults to dim=1)
    m = jnp.max(logits, axis=-1, keepdims=True)
    e = jnp.exp(logits - m)
    denom = jnp.sum(e, axis=-1, keepdims=True)
    o_ref[...] = (e * pl.reciprocal(denom, approx=False)).astype(o_ref.dtype)


def pad_hidden_params(w1, b1, w2, b2, multiple=128):
    """Zero-pad the hidden dimension up to a multiple of 128.

    relu(0) = 0 and the corresponding zero rows of w2 add nothing to the
    logits, so the forward pass is bit-identical to the unpadded network while
    making the hidden intermediate lane-dense on the TPU (full 128-lane vregs
    and full MXU contracting dim for the second matmul).
    """
    H = w1.shape[1]
    Hp = _round_up(H, multiple)
    if Hp != H:
        w1 = jnp.pad(w1, ((0, 0), (0, Hp - H)))
        b1 = jnp.pad(b1, ((0, 0), (0, Hp - H)))
        w2 = jnp.pad(w2, ((0, Hp - H), (0, 0)))
    return w1, b1, w2, b2


def three_layers_nn_forward(x, w1, b1, w2, b2, *, block_b=512):
    """x: (B, In) f32; w1: (In, Hp); b1: (1, Hp); w2: (Hp, Out); b2: (1, Out).
    Weights should already be hidden-padded (see pad_hidden_params).
    Returns (B, Out) f32 probabilities."""
    B, n_in = x.shape
    Hp = w1.shape[1]
    Out = w2.shape[1]

    # Batch tile: multiple of 8 sublanes, capped at block_b. Pad B up to a tile
    # multiple so the grid streams (TB, In) -> (TB, Out) row blocks while the
    # weights stay VMEM-resident (their block index never changes).
    tb = min(block_b, _round_up(B, 8))
    tb = _round_up(tb, 8)
    pB = _round_up(B, tb)
    if pB != B:
        x = jnp.pad(x, ((0, pB - B), (0, 0)))
    grid = (pB // tb,)

    weight_bytes = 4 * (w1.size + b1.size + w2.size + b2.size)
    cost = pl.CostEstimate(
        flops=2 * pB * (n_in * Hp + Hp * Out),
        transcendentals=pB * Out,
        bytes_accessed=4 * pB * (n_in + Out) + weight_bytes,
    )

    out = pl.pallas_call(
        mlp_softmax_kernel,
        out_shape=jax.ShapeDtypeStruct((pB, Out), jnp.float32),
        grid=grid,
        in_specs=[
            pl.BlockSpec((tb, n_in), lambda i: (i, 0)),   # streamed / double-buffered
            pl.BlockSpec((n_in, Hp), lambda i: (0, 0)),   # VMEM-resident weights
            pl.BlockSpec((1, Hp), lambda i: (0, 0)),
            pl.BlockSpec((Hp, Out), lambda i: (0, 0)),
            pl.BlockSpec((1, Out), lambda i: (0, 0)),
        ],
        out_specs=pl.BlockSpec((tb, Out), lambda i: (i, 0)),
        compiler_params=pltpu.CompilerParams(
            dimension_semantics=("parallel",),  # 2-TC sharding on v7x; harmless elsewhere
        ),
        cost_estimate=cost,
    )(x, w1, b1, w2, b2)
    return out[:B]


def init_params(key, n_in, n_hidden, n_out):
    """Deterministic init mimicking nn.Linear default (uniform(-1/sqrt(fan_in), +))."""
    k1, k2, k3, k4 = jax.random.split(key, 4)
    bound1 = 1.0 / jnp.sqrt(jnp.float32(n_in))
    bound2 = 1.0 / jnp.sqrt(jnp.float32(n_hidden))
    # stored directly as (in, out) so the kernel avoids in-kernel transposes
    w1 = jax.random.uniform(k1, (n_in, n_hidden), jnp.float32, -bound1, bound1)
    b1 = jax.random.uniform(k2, (1, n_hidden), jnp.float32, -bound1, bound1)
    w2 = jax.random.uniform(k3, (n_hidden, n_out), jnp.float32, -bound2, bound2)
    b2 = jax.random.uniform(k4, (1, n_out), jnp.float32, -bound2, bound2)
    return w1, b1, w2, b2


if __name__ == "__main__":
    # Iris: 4 input features, 3 classes, hidden=100 (padded to 128 for the TPU)
    Input, Hidden, Output = 4, 100, 3

    key = jax.random.PRNGKey(0)
    kx, kp, kx2 = jax.random.split(key, 3)
    w1, b1, w2, b2 = init_params(kp, Input, Hidden, Output)
    pw1, pb1, pw2, pb2 = pad_hidden_params(w1, b1, w2, b2)

    def reference(x):
        h = jnp.maximum(x @ w1 + b1, 0.0)
        return jax.nn.softmax(h @ w2 + b2, axis=-1)

    # Case 1: Iris-sized batch (single grid step).
    batch = 8
    x = jax.random.normal(kx, (batch, Input), jnp.float32)
    out = jax.block_until_ready(three_layers_nn_forward(x, pw1, pb1, pw2, pb2))
    assert out.shape == (batch, Output)
    assert jnp.allclose(out, reference(x), atol=1e-5, rtol=1e-5)
    assert jnp.allclose(jnp.sum(out, axis=-1), 1.0, atol=1e-5)

    # Case 2: larger, non-tile-multiple batch -> multi-step pipelined grid
    # (exercises row padding + weight residency across grid steps).
    batch2 = 200
    x2 = jax.random.normal(kx2, (batch2, Input), jnp.float32)
    out2 = jax.block_until_ready(
        three_layers_nn_forward(x2, pw1, pb1, pw2, pb2, block_b=64)
    )
    assert out2.shape == (batch2, Output)
    assert jnp.allclose(out2, reference(x2), atol=1e-5, rtol=1e-5)
    assert jnp.allclose(jnp.sum(out2, axis=-1), 1.0, atol=1e-5)

    print("KERNEL_OK")
</pallas_src>

<mosaic_0001>
module attributes {stable_mosaic.version = 11 : i64} {
  func.func @mlp_softmax_kernel(%arg0: i32, %arg1: memref<8x4xf32, #tpu.memory_space<vmem>>, %arg2: memref<4x128xf32, #tpu.memory_space<vmem>>, %arg3: memref<1x128xf32, #tpu.memory_space<vmem>>, %arg4: memref<128x3xf32, #tpu.memory_space<vmem>>, %arg5: memref<1x3xf32, #tpu.memory_space<vmem>>, %arg6: memref<8x3xf32, #tpu.memory_space<vmem>>) attributes {dimension_semantics = [#tpu.dimension_semantics<parallel>], iteration_bounds = array<i64: 1>, scalar_prefetch = 0 : i64, scratch_operands = 0 : i64, tpu.core_type = #tpu.core_type<tc>, window_params = [{transform_indices = @transform_0, window_bounds = array<i64: 8, 4>}, {pipeline_mode = #tpu.pipeline_mode<synchronous>, transform_indices = @transform_1, window_bounds = array<i64: 4, 128>}, {pipeline_mode = #tpu.pipeline_mode<synchronous>, transform_indices = @transform_2, window_bounds = array<i64: 1, 128>}, {pipeline_mode = #tpu.pipeline_mode<synchronous>, transform_indices = @transform_3, window_bounds = array<i64: 128, 3>}, {pipeline_mode = #tpu.pipeline_mode<synchronous>, transform_indices = @transform_4, window_bounds = array<i64: 1, 3>}, {transform_indices = @transform_5, window_bounds = array<i64: 8, 3>}]} {
    %c0 = arith.constant 0 : index
    %c0_0 = arith.constant 0 : index
    %0 = vector.load %arg1[%c0, %c0_0] : memref<8x4xf32, #tpu.memory_space<vmem>>, vector<8x4xf32>
    %c0_1 = arith.constant 0 : index
    %c0_2 = arith.constant 0 : index
    %1 = vector.load %arg2[%c0_1, %c0_2] : memref<4x128xf32, #tpu.memory_space<vmem>>, vector<4x128xf32>
    %cst = arith.constant dense<0.000000e+00> : vector<8x128xf32>
    %2 = tpu.matmul %0, %1, %cst {dimension_numbers = #tpu.dot_dimension_numbers<[1], [0], [0], [1], [0, 0, 1, 1], [], []>} : vector<8x4xf32>, vector<4x128xf32>, vector<8x128xf32> -> vector<8x128xf32>
    %c0_3 = arith.constant 0 : index
    %c0_4 = arith.constant 0 : index
    %3 = vector.load %arg3[%c0_3, %c0_4] : memref<1x128xf32, #tpu.memory_space<vmem>>, vector<1x128xf32>
    %4 = vector.broadcast %3 : vector<1x128xf32> to vector<8x128xf32>
    %5 = arith.addf %2, %4 : vector<8x128xf32>
    %cst_5 = arith.constant 0.000000e+00 : f32
    %6 = vector.broadcast %cst_5 : f32 to vector<8x128xf32>
    %7 = arith.maximumf %5, %6 : vector<8x128xf32>
    %c0_6 = arith.constant 0 : index
    %c0_7 = arith.constant 0 : index
    %8 = vector.load %arg4[%c0_6, %c0_7] : memref<128x3xf32, #tpu.memory_space<vmem>>, vector<128x3xf32>
    %cst_8 = arith.constant dense<0.000000e+00> : vector<8x3xf32>
    %9 = tpu.matmul %7, %8, %cst_8 {dimension_numbers = #tpu.dot_dimension_numbers<[1], [0], [0], [1], [0, 0, 1, 1], [], []>} : vector<8x128xf32>, vector<128x3xf32>, vector<8x3xf32> -> vector<8x3xf32>
    %c0_9 = arith.constant 0 : index
    %c0_10 = arith.constant 0 : index
    %10 = vector.load %arg5[%c0_9, %c0_10] : memref<1x3xf32, #tpu.memory_space<vmem>>, vector<1x3xf32>
    %11 = vector.broadcast %10 : vector<1x3xf32> to vector<8x3xf32>
    %12 = arith.addf %9, %11 : vector<8x3xf32>
    %cst_11 = arith.constant dense<0xFF800000> : vector<8xf32>
    %13 = vector.multi_reduction <maximumf>, %12, %cst_11 [1] : vector<8x3xf32> to vector<8xf32>
    %14 = vector.shape_cast %13 : vector<8xf32> to vector<8x1xf32>
    %15 = vector.broadcast %14 : vector<8x1xf32> to vector<8x3xf32>
    %16 = arith.subf %12, %15 : vector<8x3xf32>
    %17 = math.exp %16 : vector<8x3xf32>
    %cst_12 = arith.constant dense<0.000000e+00> : vector<8xf32>
    %18 = vector.multi_reduction <add>, %17, %cst_12 [1] : vector<8x3xf32> to vector<8xf32>
    %19 = vector.shape_cast %18 : vector<8xf32> to vector<8x1xf32>
    %20 = tpu.reciprocal %19 : vector<8x1xf32> -> vector<8x1xf32>
    %21 = vector.broadcast %20 : vector<8x1xf32> to vector<8x3xf32>
    %22 = arith.mulf %17, %21 : vector<8x3xf32>
    %c0_13 = arith.constant 0 : index
    %c0_14 = arith.constant 0 : index
    %23 = vector.load %arg6[%c0_13, %c0_14] : memref<8x3xf32, #tpu.memory_space<vmem>>, vector<8x3xf32>
    tpu.vector_store %arg6[%c0_13, %c0_14], %22 {strides = array<i32>} : memref<8x3xf32, #tpu.memory_space<vmem>>, vector<8x3xf32>,
    return
  }
  func.func @transform_0(%arg0: i32) -> (i32, i32) {
    %c0_i32 = arith.constant 0 : i32
    %c0_i32_0 = arith.constant 0 : i32
    return %arg0, %c0_i32 : i32, i32
  }
  func.func @transform_1(%arg0: i32) -> (i32, i32) {
    %c0_i32 = arith.constant 0 : i32
    %c0_i32_0 = arith.constant 0 : i32
    %c0_i32_1 = arith.constant 0 : i32
    return %c0_i32, %c0_i32_0 : i32, i32
  }
  func.func @transform_2(%arg0: i32) -> (i32, i32) {
    %c0_i32 = arith.constant 0 : i32
    %c0_i32_0 = arith.constant 0 : i32
    %c0_i32_1 = arith.constant 0 : i32
    return %c0_i32, %c0_i32_0 : i32, i32
  }
  func.func @transform_3(%arg0: i32) -> (i32, i32) {
    %c0_i32 = arith.constant 0 : i32
    %c0_i32_0 = arith.constant 0 : i32
    %c0_i32_1 = arith.constant 0 : i32
    return %c0_i32, %c0_i32_0 : i32, i32
  }
  func.func @transform_4(%arg0: i32) -> (i32, i32) {
    %c0_i32 = arith.constant 0 : i32
    %c0_i32_0 = arith.constant 0 : i32
    %c0_i32_1 = arith.constant 0 : i32
    return %c0_i32, %c0_i32_0 : i32, i32
  }
  func.func @transform_5(%arg0: i32) -> (i32, i32) {
    %c0_i32 = arith.constant 0 : i32
    %c0_i32_0 = arith.constant 0 : i32
    return %arg0, %c0_i32 : i32, i32
  }
}

</mosaic_0001>

<bundles_post_ra>
// kernel: tpu_custom_call.1
= control target key start
LH: loop header
LB: loop body
LE: loop exit
PB: predicated region body
PF: predicated region fallthrough
CT: control target
= control target key end

     0   :  { %vm33_vm0 = vcmask 1043456   ;;  %vm29_vm1 = vcmask 31744   ;;  %v312_v0 = vmov 0.0   ;;  %vm313_vm2 = vmmov 0   ;;  %s411_s1 = inlined_call_operand.vmem [shape: f32[4,128], index: 1, kind: input, shape index: {}]   ;;  %s412_s0 = inlined_call_operand.vmem [shape: f32[8,4], index: 0, kind: input, shape index: {}]   ;;  %s413_s3 = inlined_call_operand.vmem [shape: f32[128,3], index: 3, kind: input, shape index: {}]   ;;  %s414_s2 = inlined_call_operand.vmem [shape: f32[1,128], index: 2, kind: input, shape index: {}]   ;;  %s415_s4 = inlined_call_operand.vmem [shape: f32[1,3], index: 4, kind: input, shape index: {}]   ;;  %s416_s5 = inlined_call_operand.vmem [shape: f32[8,3], index: 5, kind: output, shape index: {}]  }
   0x1   :  { %241 = vmatprep.subr.mxu0 %v312_v0  ;;  %v21_v1 = vld [vmem:[%s411_s1] sm:$0xf]  ;;  %243 = vmatprep.mubr.msk.f32.mxu0 %vm313_vm2, %v312_v0  ;;  %v314_v4 = vmov 0.0|0.0   ;;  %v109_v5 = vld [vmem:[%s413_s3 + $0x8] sm:$0xff]  ;;  %v110_v6 = vld [vmem:[%s413_s3 + $0x10] sm:$0xff]  ;;  %vm201_vm3 = vcmask 23552  }
   0x2   :  { %v20_v2 = vld [vmem:[%s412_s0] sm:$0xff]  ;;  %242 = vmatpush3.msk.msra.mxu0 %vm33_vm0, %v21_v1  ;;  %281 = vmatprep.subr.bf16.mxu1 %v314_v4  ;;  %v111_v7 = vld [vmem:[%s413_s3 + $0x18] sm:$0xff]  ;;  %v113_v11 = vld [vmem:[%s413_s3 + $0x28] sm:$0xff] }
   0x3   :  { %v108_v3 = vld [vmem:[%s413_s3] sm:$0xff]  ;;  %244 = vmatmul.mubr.msk.f32.vlgmr.msra.gmra.mrb[0].mxu0 %vm29_vm1, %v20_v2  ;;  %278 = vmatprep.mubr.msk.f32.mxu1 %vm313_vm2, %v312_v0  ;;  %v285_v9 = vpack.c.bf16 %v111_v7, %v110_v6  ;;  %v114_v13 = vld [vmem:[%s413_s3 + $0x30] sm:$0xff]  ;;  %v115_v14 = vld [vmem:[%s413_s3 + $0x38] sm:$0xff] }
   0x4   :  { %v282_v8 = vpack.c.bf16 %v109_v5, %v108_v3  ;;  %v112_v10 = vld [vmem:[%s413_s3 + $0x20] sm:$0xff]  ;;  %v291_v15 = vpack.c.bf16 %v115_v14, %v114_v13  ;;  %v117_v17 = vld [vmem:[%s413_s3 + $0x48] sm:$0xff]  ;;  %v118_v19 = vld [vmem:[%s413_s3 + $0x50] sm:$0xff] }
   0x5   :  { %v288_v12 = vpack.c.bf16 %v113_v11, %v112_v10  ;;  %v116_v16 = vld [vmem:[%s413_s3 + $0x40] sm:$0xff]  ;;  %v119_v20 = vld [vmem:[%s413_s3 + $0x58] sm:$0xff]  ;;  %v121_v23 = vld [vmem:[%s413_s3 + $0x68] sm:$0xff] }
   0x6   :  { %283 = vmatpush3.bf16.msra.mxu1 %v282_v8  ;;  %v294_v18 = vpack.c.bf16 %v117_v17, %v116_v16  ;;  %v297_v21 = vpack.c.bf16 %v119_v20, %v118_v19  ;;  %v120_v22 = vld [vmem:[%s413_s3 + $0x60] sm:$0xff]  ;;  %v122_v25 = vld [vmem:[%s413_s3 + $0x70] sm:$0xff]  ;;  %v123_v26 = vld [vmem:[%s413_s3 + $0x78] sm:$0xff] }
   0x7   :  { %284 = vmatprep.subr.bf16.mxu1 %v314_v4  ;;  %v300_v24 = vpack.c.bf16 %v121_v23, %v120_v22  ;;  %v303_v27 = vpack.c.bf16 %v123_v26, %v122_v25  ;;  %v218_v28 = vld [vmem:[%s414_s2] ss:$0 sm:$0xff] }
   0x8   :  { %v221_v33 = vld [vmem:[%s415_s4] ss:$0 sm:$0xff] }
   0xa   :  { %286 = vmatpush3.bf16.msra.mxu1 %v285_v9 }
   0xb   :  { %287 = vmatprep.subr.bf16.mxu1 %v314_v4 }
   0xe   :  { %289 = vmatpush3.bf16.msra.mxu1 %v288_v12 }
   0xf   :  { %290 = vmatprep.subr.bf16.mxu1 %v314_v4 }
  0x12   :  { %292 = vmatpush3.bf16.msra.mxu1 %v291_v15 }
  0x13   :  { %293 = vmatprep.subr.bf16.mxu1 %v314_v4 }
  0x16   :  { %295 = vmatpush3.bf16.msra.mxu1 %v294_v18 }
  0x17   :  { %296 = vmatprep.subr.bf16.mxu1 %v314_v4 }
  0x1a   :  { %298 = vmatpush3.bf16.msra.mxu1 %v297_v21 }
  0x1b   :  { %299 = vmatprep.subr.bf16.mxu1 %v314_v4 }
  0x1e   :  { %301 = vmatpush3.bf16.msra.mxu1 %v300_v24 }
  0x1f   :  { %302 = vmatprep.subr.bf16.mxu1 %v314_v4 }
  0x22   :  { %304 = vmatpush3.bf16.msra.mxu1 %v303_v27 }
  0xd6   :  { %v103_v29 = vpop.f32.mrb[0].mxu0 }
  0xd7   :  { %v104_v30 = vadd.f32 %v218_v28, %v103_v29  ;;  %v245_v31 = vpop.f32.mrb[1].mxu0 }
  0xd9   :  { %v107_v32 = vmax.f32 %v104_v30, 0.0 }
  0xdb   :  { %279 = vmatmul.mubr.f32.vlgmr.msra.gmra.mrb[0].mxu1 %v107_v32 }
 0x1ae   :  { %v197_v34 = vpop.f32.mrb[0].mxu1 }
 0x1af   :  { %v198_v35 = vadd.f32 %v221_v33, %v197_v34  ;;  %v280_v36 = vpop.f32.mrb[1].mxu1 }
 0x1b1   :  { %v202_v37 = vsel %vm201_vm3, %v198_v35, -inf }
 0x1b2   :  { %203 = vmax.xlane.f32.xlu0 %v202_v37 }
 0x23f   :  { %v204_v38 = vpop.xlane.xlu0 %203 }
 0x240   :  { %v205_v39 = vsub.f32 %v198_v35, %v204_v38 }
 0x242   :  { %v206_v40 = vmul.f32 1.442695, %v205_v39 }
 0x244   :  { %308 = vpow2.f32 %v206_v40 }
 0x24e   :  { %v309_v41 = vpop.eup %308 }
 0x24f   :  { %v208_v42 = vsel %vm201_vm3, %v309_v41, 0.0 }
 0x250   :  { %209 = vadd.xlane.f32.xlu0 %v208_v42 }
 0x2dd   :  { %v210_v43 = vpop.xlane.xlu0 %209 }
 0x2de   :  { %310 = vrcp.f32 %v210_v43 }
 0x2e8   :  { %v311_v44 = vpop.eup %310 }
 0x2e9   :  { %v212_v45 = vmul.f32 %v311_v44, %v309_v41 }
 0x2eb   :  { %213 = vst.msk [vmem:[%s416_s5] sm:$0xff] %vm201_vm3, %v212_v45 }

</bundles_post_ra>
